<compile_context>
chip_gen: v5e
topology: v5e:2x2
jax: 0.10.0
libtpu: 0.0.40
codegen_flags: <defaults>
</compile_context>

<pallas_src>
import functools
import math

import jax
import jax.numpy as jnp
from jax.experimental import pallas as pl
from jax.experimental.pallas import tpu as pltpu


def _round_up(a, b):
    return (a + b - 1) // b * b


def _vmem_capacity_bytes():
    """Physical VMEM per core; conservative fallback if the query is unavailable."""
    try:
        info = pltpu.get_tpu_info()
        cap = getattr(info, "vmem_capacity_bytes", None)
        if cap:
            return int(cap)
    except Exception:
        pass
    return 64 * (1 << 20)  # assume the smallest (v7x-like) VMEM


def _pick_row_tile(ho, wq, cin, cout_p, out_itemsize, vmem_cap):
    """Largest output-row block whose double-buffered working set fits VMEM."""
    budget = min(vmem_cap // 2, 64 * (1 << 20))

    def need(th):
        lb = _round_up(th * wq + wq + 1, 8)          # input block rows (with halo)
        return (2 * 4 * lb * cin * 2                 # double-buffered bf16 input block
                + 2 * th * wq * cout_p * out_itemsize  # double-buffered output block
                + th * wq * cout_p * 4               # f32 accumulator
                + 2 * 9 * cin * cout_p * 2           # bf16 weights (counted x2)
                + 2 * cout_p * 4)                    # bias

    th = max(ho, 1)
    while th > 1 and need(th) > budget:
        th = (th + 1) // 2
    return th


def _conv3x3s2_kernel(xs_ref, w_ref, b_ref, o_ref, *, wq):
    """One (batch, output-row-block) step of the strided 3x3 conv.

    xs_ref: (4, L_blk, Cin)  bf16 parity-split input, flattened spatial (+halo)
    w_ref : (9, Cin, Cout_p) bf16 per-tap weight matrices (resident)
    b_ref : (1, Cout_p)      f32 bias (resident)
    o_ref : (M_blk, Cout_p)  output block, M_blk = th * Wq flat output pixels
    """
    m = o_ref.shape[0]
    acc = jnp.zeros(o_ref.shape, jnp.float32)
    for kh in range(3):
        for kw in range(3):
            p = (kh % 2) * 2 + (kw % 2)        # which parity grid this tap reads
            s = (kh // 2) * wq + (kw // 2)     # static flat shift inside that grid
            acc = acc + jnp.dot(xs_ref[p, s:s + m, :], w_ref[kh * 3 + kw],
                                preferred_element_type=jnp.float32)
    o_ref[...] = (acc + b_ref[...]).astype(o_ref.dtype)


def downsample_forward(x_nchw, w_oihw, bias, t=None):
    """Equivalent of DownSample.forward(x, t) -- `t` is ignored."""
    del t
    N, C, H, W = x_nchw.shape
    Cout, Cin, KH, KW = w_oihw.shape
    assert C == Cin == Cout and (KH, KW) == (3, 3)
    stride, pad = 2, 1
    Ho = (H + 2 * pad - KH) // stride + 1
    Wo = (W + 2 * pad - KW) // stride + 1
    Hq, Wq = Ho + 1, Wo + 1            # parity-grid extents (incl. 1 halo row/col)

    compute_dtype = jnp.bfloat16
    out_dtype = x_nchw.dtype
    out_itemsize = jnp.dtype(out_dtype).itemsize

    # ---- glue (fused by XLA into one producer): NCHW->NHWC, bf16 cast, pad,
    #      space-to-depth parity split, flatten spatial -----------------------
    x = jnp.transpose(x_nchw, (0, 2, 3, 1)).astype(compute_dtype)        # (N,H,W,C)
    xp = jnp.pad(x, ((0, 0), (1, 2 * Hq - H - 1), (1, 2 * Wq - W - 1), (0, 0)))
    xq = xp.reshape(N, Hq, 2, Wq, 2, C).transpose(0, 2, 4, 1, 3, 5)      # (N,2,2,Hq,Wq,C)
    xf = xq.reshape(N, 4, Hq * Wq, C)                                    # flat spatial

    # weights OIHW -> (kh,kw,ci,co) -> (9, Cin, Cout_p) bf16; bias -> (1, Cout_p) f32.
    Cout_p = _round_up(Cout, 128)                    # lane-dense output stores
    Wm = jnp.transpose(w_oihw, (2, 3, 1, 0)).reshape(9, Cin, Cout)
    Wm = jnp.pad(Wm.astype(compute_dtype), ((0, 0), (0, 0), (0, Cout_p - Cout)))
    bm = jnp.pad(bias.astype(jnp.float32), (0, Cout_p - Cout)).reshape(1, Cout_p)

    # ---- output-row blocking with a 1-parity-row halo ------------------------
    vmem_cap = _vmem_capacity_bytes()
    th = _pick_row_tile(Ho, Wq, Cin, Cout_p, out_itemsize, vmem_cap)
    nrb = pl.cdiv(Ho, th)
    M_blk = th * Wq
    L_blk = _round_up(M_blk + Wq + 1, 8)             # block rows + halo, aligned
    need_rows = (nrb - 1) * M_blk + L_blk
    xf = jnp.pad(xf, ((0, 0), (0, 0), (0, need_rows - Hq * Wq), (0, 0)))
    if nrb == 1:
        xsb = xf[:, None]                                            # (N,1,4,L_blk,C)
    else:
        idx = (jnp.arange(nrb) * M_blk)[:, None] + jnp.arange(L_blk)[None, :]
        xsb = xf[:, :, idx, :].transpose(0, 2, 1, 3, 4)              # (N,nrb,4,L_blk,C)

    vmem_limit = int(min(vmem_cap * 3 // 4, 96 * (1 << 20)))
    cost = pl.CostEstimate(
        flops=2 * N * nrb * M_blk * 9 * Cin * Cout_p,
        transcendentals=0,
        bytes_accessed=(xsb.size * 2 + Wm.size * 2 + bm.size * 4
                        + N * nrb * M_blk * Cout_p * out_itemsize),
    )

    kernel = functools.partial(_conv3x3s2_kernel, wq=Wq)

    # ---- hot path: tiled, double-buffered 9-tap matmul conv on the MXU -------
    out = pl.pallas_call(
        kernel,
        out_shape=jax.ShapeDtypeStruct((N, nrb, M_blk, Cout_p), out_dtype),
        grid_spec=pltpu.PrefetchScalarGridSpec(
            num_scalar_prefetch=0,
            grid=(N, nrb),
            in_specs=[
                pl.BlockSpec((None, None, 4, L_blk, Cin),
                             lambda n, r: (n, r, 0, 0, 0)),          # input (pipelined)
                pl.BlockSpec((9, Cin, Cout_p), lambda n, r: (0, 0, 0)),  # weights (resident)
                pl.BlockSpec((1, Cout_p), lambda n, r: (0, 0)),          # bias (resident)
            ],
            out_specs=pl.BlockSpec((None, None, M_blk, Cout_p),
                                   lambda n, r: (n, r, 0, 0)),
        ),
        compiler_params=pltpu.CompilerParams(
            dimension_semantics=("parallel", "parallel"),   # shard across TCs on v7x
            vmem_limit_bytes=vmem_limit,
        ),
        cost_estimate=cost,
    )(xsb, Wm, bm)

    # drop halo column / padded rows / padded channels, back to NCHW
    out = out.reshape(N, nrb * th, Wq, Cout_p)[:, :Ho, :Wo, :Cout]
    return jnp.transpose(out, (0, 3, 1, 2))


def init_downsample_params(key, n_channels):
    """Deterministic Conv2d(n_channels, n_channels, 3, 2, 1) params
    (PyTorch-style uniform(-1/sqrt(fan_in), 1/sqrt(fan_in)))."""
    kw_key, b_key = jax.random.split(key)
    fan_in = n_channels * 3 * 3
    bound = 1.0 / math.sqrt(fan_in)
    weight = jax.random.uniform(
        kw_key, (n_channels, n_channels, 3, 3), jnp.float32, -bound, bound)
    bias = jax.random.uniform(b_key, (n_channels,), jnp.float32, -bound, bound)
    return weight, bias


if __name__ == "__main__":
    key = jax.random.PRNGKey(0)
    k_x, k_t, k_p = jax.random.split(key, 3)

    N, C, H, W = 2, 4, 16, 16
    x = jax.random.normal(k_x, (N, C, H, W), jnp.float32)
    t = jax.random.normal(k_t, (N, 32), jnp.float32)   # ignored, as in the module
    weight, bias = init_downsample_params(k_p, C)

    fwd = jax.jit(downsample_forward)
    out = jax.block_until_ready(fwd(x, weight, bias, t))
    assert out.shape == (N, C, H // 2, W // 2), out.shape

    # Sanity check vs XLA's native conv on the same bf16-cast operands
    # (kernel feeds the MXU bf16 with f32 accumulation).
    ref = jax.lax.conv_general_dilated(
        x.astype(jnp.bfloat16), weight.astype(jnp.bfloat16),
        window_strides=(2, 2), padding=((1, 1), (1, 1)),
        dimension_numbers=("NCHW", "OIHW", "NCHW"),
        preferred_element_type=jnp.float32,
    ) + bias.reshape(1, C, 1, 1)
    err = float(jnp.max(jnp.abs(out - ref)))
    assert jnp.allclose(out, ref, atol=2e-2, rtol=2e-2), err

    print("KERNEL_OK")
</pallas_src>

<mosaic_0001>
module attributes {stable_mosaic.version = 11 : i64} {
  func.func @_conv3x3s2_kernel(%arg0: i32, %arg1: i32, %arg2: memref<1x1x4x88x4xbf16, #tpu.memory_space<vmem>>, %arg3: memref<9x4x128xbf16, #tpu.memory_space<vmem>>, %arg4: memref<1x128xf32, #tpu.memory_space<vmem>>, %arg5: memref<1x1x72x128xf32, #tpu.memory_space<vmem>>) attributes {dimension_semantics = [#tpu.dimension_semantics<parallel>, #tpu.dimension_semantics<parallel>], iteration_bounds = array<i64: 2, 1>, scalar_prefetch = 0 : i64, scratch_operands = 0 : i64, tpu.core_type = #tpu.core_type<tc>, window_params = [{transform_indices = @transform_0, window_bounds = array<i64: 1, 1, 4, 88, 4>}, {pipeline_mode = #tpu.pipeline_mode<synchronous>, transform_indices = @transform_1, window_bounds = array<i64: 9, 4, 128>}, {pipeline_mode = #tpu.pipeline_mode<synchronous>, transform_indices = @transform_2, window_bounds = array<i64: 1, 128>}, {transform_indices = @transform_3, window_bounds = array<i64: 1, 1, 72, 128>}]} {
    %cst = arith.constant 0.000000e+00 : f32
    %0 = vector.broadcast %cst : f32 to vector<72x128xf32>
    %c0 = arith.constant 0 : index
    %c0_0 = arith.constant 0 : index
    %c0_1 = arith.constant 0 : index
    %c0_2 = arith.constant 0 : index
    %c0_3 = arith.constant 0 : index
    %1 = vector.load %arg2[%c0, %c0_0, %c0_1, %c0_2, %c0_3] : memref<1x1x4x88x4xbf16, #tpu.memory_space<vmem>>, vector<1x1x1x72x4xbf16>
    %2 = vector.shape_cast %1 : vector<1x1x1x72x4xbf16> to vector<72x4xbf16>
    %c0_4 = arith.constant 0 : index
    %c0_5 = arith.constant 0 : index
    %c0_6 = arith.constant 0 : index
    %3 = vector.load %arg3[%c0_4, %c0_5, %c0_6] : memref<9x4x128xbf16, #tpu.memory_space<vmem>>, vector<1x4x128xbf16>
    %4 = vector.shape_cast %3 : vector<1x4x128xbf16> to vector<4x128xbf16>
    %cst_7 = arith.constant dense<0.000000e+00> : vector<72x128xf32>
    %5 = tpu.matmul %2, %4, %cst_7 {dimension_numbers = #tpu.dot_dimension_numbers<[1], [0], [0], [1], [0, 0, 1, 1], [], []>} : vector<72x4xbf16>, vector<4x128xbf16>, vector<72x128xf32> -> vector<72x128xf32>
    %6 = arith.addf %0, %5 : vector<72x128xf32>
    %c0_8 = arith.constant 0 : index
    %c0_9 = arith.constant 0 : index
    %c1 = arith.constant 1 : index
    %c0_10 = arith.constant 0 : index
    %c0_11 = arith.constant 0 : index
    %7 = vector.load %arg2[%c0_8, %c0_9, %c1, %c0_10, %c0_11] : memref<1x1x4x88x4xbf16, #tpu.memory_space<vmem>>, vector<1x1x1x72x4xbf16>
    %8 = vector.shape_cast %7 : vector<1x1x1x72x4xbf16> to vector<72x4xbf16>
    %c1_12 = arith.constant 1 : index
    %c0_13 = arith.constant 0 : index
    %c0_14 = arith.constant 0 : index
    %9 = vector.load %arg3[%c1_12, %c0_13, %c0_14] : memref<9x4x128xbf16, #tpu.memory_space<vmem>>, vector<1x4x128xbf16>
    %10 = vector.shape_cast %9 : vector<1x4x128xbf16> to vector<4x128xbf16>
    %cst_15 = arith.constant dense<0.000000e+00> : vector<72x128xf32>
    %11 = tpu.matmul %8, %10, %cst_15 {dimension_numbers = #tpu.dot_dimension_numbers<[1], [0], [0], [1], [0, 0, 1, 1], [], []>} : vector<72x4xbf16>, vector<4x128xbf16>, vector<72x128xf32> -> vector<72x128xf32>
    %12 = arith.addf %6, %11 : vector<72x128xf32>
    %c0_16 = arith.constant 0 : index
    %c0_17 = arith.constant 0 : index
    %c0_18 = arith.constant 0 : index
    %c1_19 = arith.constant 1 : index
    %c0_20 = arith.constant 0 : index
    %13 = vector.load %arg2[%c0_16, %c0_17, %c0_18, %c1_19, %c0_20] : memref<1x1x4x88x4xbf16, #tpu.memory_space<vmem>>, vector<1x1x1x72x4xbf16>
    %14 = vector.shape_cast %13 : vector<1x1x1x72x4xbf16> to vector<72x4xbf16>
    %c2 = arith.constant 2 : index
    %c0_21 = arith.constant 0 : index
    %c0_22 = arith.constant 0 : index
    %15 = vector.load %arg3[%c2, %c0_21, %c0_22] : memref<9x4x128xbf16, #tpu.memory_space<vmem>>, vector<1x4x128xbf16>
    %16 = vector.shape_cast %15 : vector<1x4x128xbf16> to vector<4x128xbf16>
    %cst_23 = arith.constant dense<0.000000e+00> : vector<72x128xf32>
    %17 = tpu.matmul %14, %16, %cst_23 {dimension_numbers = #tpu.dot_dimension_numbers<[1], [0], [0], [1], [0, 0, 1, 1], [], []>} : vector<72x4xbf16>, vector<4x128xbf16>, vector<72x128xf32> -> vector<72x128xf32>
    %18 = arith.addf %12, %17 : vector<72x128xf32>
    %c0_24 = arith.constant 0 : index
    %c0_25 = arith.constant 0 : index
    %c2_26 = arith.constant 2 : index
    %c0_27 = arith.constant 0 : index
    %c0_28 = arith.constant 0 : index
    %19 = vector.load %arg2[%c0_24, %c0_25, %c2_26, %c0_27, %c0_28] : memref<1x1x4x88x4xbf16, #tpu.memory_space<vmem>>, vector<1x1x1x72x4xbf16>
    %20 = vector.shape_cast %19 : vector<1x1x1x72x4xbf16> to vector<72x4xbf16>
    %c3 = arith.constant 3 : index
    %c0_29 = arith.constant 0 : index
    %c0_30 = arith.constant 0 : index
    %21 = vector.load %arg3[%c3, %c0_29, %c0_30] : memref<9x4x128xbf16, #tpu.memory_space<vmem>>, vector<1x4x128xbf16>
    %22 = vector.shape_cast %21 : vector<1x4x128xbf16> to vector<4x128xbf16>
    %cst_31 = arith.constant dense<0.000000e+00> : vector<72x128xf32>
    %23 = tpu.matmul %20, %22, %cst_31 {dimension_numbers = #tpu.dot_dimension_numbers<[1], [0], [0], [1], [0, 0, 1, 1], [], []>} : vector<72x4xbf16>, vector<4x128xbf16>, vector<72x128xf32> -> vector<72x128xf32>
    %24 = arith.addf %18, %23 : vector<72x128xf32>
    %c0_32 = arith.constant 0 : index
    %c0_33 = arith.constant 0 : index
    %c3_34 = arith.constant 3 : index
    %c0_35 = arith.constant 0 : index
    %c0_36 = arith.constant 0 : index
    %25 = vector.load %arg2[%c0_32, %c0_33, %c3_34, %c0_35, %c0_36] : memref<1x1x4x88x4xbf16, #tpu.memory_space<vmem>>, vector<1x1x1x72x4xbf16>
    %26 = vector.shape_cast %25 : vector<1x1x1x72x4xbf16> to vector<72x4xbf16>
    %c4 = arith.constant 4 : index
    %c0_37 = arith.constant 0 : index
    %c0_38 = arith.constant 0 : index
    %27 = vector.load %arg3[%c4, %c0_37, %c0_38] : memref<9x4x128xbf16, #tpu.memory_space<vmem>>, vector<1x4x128xbf16>
    %28 = vector.shape_cast %27 : vector<1x4x128xbf16> to vector<4x128xbf16>
    %cst_39 = arith.constant dense<0.000000e+00> : vector<72x128xf32>
    %29 = tpu.matmul %26, %28, %cst_39 {dimension_numbers = #tpu.dot_dimension_numbers<[1], [0], [0], [1], [0, 0, 1, 1], [], []>} : vector<72x4xbf16>, vector<4x128xbf16>, vector<72x128xf32> -> vector<72x128xf32>
    %30 = arith.addf %24, %29 : vector<72x128xf32>
    %c0_40 = arith.constant 0 : index
    %c0_41 = arith.constant 0 : index
    %c2_42 = arith.constant 2 : index
    %c1_43 = arith.constant 1 : index
    %c0_44 = arith.constant 0 : index
    %31 = vector.load %arg2[%c0_40, %c0_41, %c2_42, %c1_43, %c0_44] : memref<1x1x4x88x4xbf16, #tpu.memory_space<vmem>>, vector<1x1x1x72x4xbf16>
    %32 = vector.shape_cast %31 : vector<1x1x1x72x4xbf16> to vector<72x4xbf16>
    %c5 = arith.constant 5 : index
    %c0_45 = arith.constant 0 : index
    %c0_46 = arith.constant 0 : index
    %33 = vector.load %arg3[%c5, %c0_45, %c0_46] : memref<9x4x128xbf16, #tpu.memory_space<vmem>>, vector<1x4x128xbf16>
    %34 = vector.shape_cast %33 : vector<1x4x128xbf16> to vector<4x128xbf16>
    %cst_47 = arith.constant dense<0.000000e+00> : vector<72x128xf32>
    %35 = tpu.matmul %32, %34, %cst_47 {dimension_numbers = #tpu.dot_dimension_numbers<[1], [0], [0], [1], [0, 0, 1, 1], [], []>} : vector<72x4xbf16>, vector<4x128xbf16>, vector<72x128xf32> -> vector<72x128xf32>
    %36 = arith.addf %30, %35 : vector<72x128xf32>
    %c0_48 = arith.constant 0 : index
    %c0_49 = arith.constant 0 : index
    %c0_50 = arith.constant 0 : index
    %c9 = arith.constant 9 : index
    %c0_51 = arith.constant 0 : index
    %37 = vector.load %arg2[%c0_48, %c0_49, %c0_50, %c9, %c0_51] : memref<1x1x4x88x4xbf16, #tpu.memory_space<vmem>>, vector<1x1x1x72x4xbf16>
    %38 = vector.shape_cast %37 : vector<1x1x1x72x4xbf16> to vector<72x4xbf16>
    %c6 = arith.constant 6 : index
    %c0_52 = arith.constant 0 : index
    %c0_53 = arith.constant 0 : index
    %39 = vector.load %arg3[%c6, %c0_52, %c0_53] : memref<9x4x128xbf16, #tpu.memory_space<vmem>>, vector<1x4x128xbf16>
    %40 = vector.shape_cast %39 : vector<1x4x128xbf16> to vector<4x128xbf16>
    %cst_54 = arith.constant dense<0.000000e+00> : vector<72x128xf32>
    %41 = tpu.matmul %38, %40, %cst_54 {dimension_numbers = #tpu.dot_dimension_numbers<[1], [0], [0], [1], [0, 0, 1, 1], [], []>} : vector<72x4xbf16>, vector<4x128xbf16>, vector<72x128xf32> -> vector<72x128xf32>
    %42 = arith.addf %36, %41 : vector<72x128xf32>
    %c0_55 = arith.constant 0 : index
    %c0_56 = arith.constant 0 : index
    %c1_57 = arith.constant 1 : index
    %c9_58 = arith.constant 9 : index
    %c0_59 = arith.constant 0 : index
    %43 = vector.load %arg2[%c0_55, %c0_56, %c1_57, %c9_58, %c0_59] : memref<1x1x4x88x4xbf16, #tpu.memory_space<vmem>>, vector<1x1x1x72x4xbf16>
    %44 = vector.shape_cast %43 : vector<1x1x1x72x4xbf16> to vector<72x4xbf16>
    %c7 = arith.constant 7 : index
    %c0_60 = arith.constant 0 : index
    %c0_61 = arith.constant 0 : index
    %45 = vector.load %arg3[%c7, %c0_60, %c0_61] : memref<9x4x128xbf16, #tpu.memory_space<vmem>>, vector<1x4x128xbf16>
    %46 = vector.shape_cast %45 : vector<1x4x128xbf16> to vector<4x128xbf16>
    %cst_62 = arith.constant dense<0.000000e+00> : vector<72x128xf32>
    %47 = tpu.matmul %44, %46, %cst_62 {dimension_numbers = #tpu.dot_dimension_numbers<[1], [0], [0], [1], [0, 0, 1, 1], [], []>} : vector<72x4xbf16>, vector<4x128xbf16>, vector<72x128xf32> -> vector<72x128xf32>
    %48 = arith.addf %42, %47 : vector<72x128xf32>
    %c0_63 = arith.constant 0 : index
    %c0_64 = arith.constant 0 : index
    %c0_65 = arith.constant 0 : index
    %c10 = arith.constant 10 : index
    %c0_66 = arith.constant 0 : index
    %49 = vector.load %arg2[%c0_63, %c0_64, %c0_65, %c10, %c0_66] : memref<1x1x4x88x4xbf16, #tpu.memory_space<vmem>>, vector<1x1x1x72x4xbf16>
    %50 = vector.shape_cast %49 : vector<1x1x1x72x4xbf16> to vector<72x4xbf16>
    %c8 = arith.constant 8 : index
    %c0_67 = arith.constant 0 : index
    %c0_68 = arith.constant 0 : index
    %51 = vector.load %arg3[%c8, %c0_67, %c0_68] : memref<9x4x128xbf16, #tpu.memory_space<vmem>>, vector<1x4x128xbf16>
    %52 = vector.shape_cast %51 : vector<1x4x128xbf16> to vector<4x128xbf16>
    %cst_69 = arith.constant dense<0.000000e+00> : vector<72x128xf32>
    %53 = tpu.matmul %50, %52, %cst_69 {dimension_numbers = #tpu.dot_dimension_numbers<[1], [0], [0], [1], [0, 0, 1, 1], [], []>} : vector<72x4xbf16>, vector<4x128xbf16>, vector<72x128xf32> -> vector<72x128xf32>
    %54 = arith.addf %48, %53 : vector<72x128xf32>
    %c0_70 = arith.constant 0 : index
    %c0_71 = arith.constant 0 : index
    %55 = vector.load %arg4[%c0_70, %c0_71] : memref<1x128xf32, #tpu.memory_space<vmem>>, vector<1x128xf32>
    %56 = vector.broadcast %55 : vector<1x128xf32> to vector<72x128xf32>
    %57 = arith.addf %54, %56 : vector<72x128xf32>
    %c0_72 = arith.constant 0 : index
    %c0_73 = arith.constant 0 : index
    %c0_74 = arith.constant 0 : index
    %c0_75 = arith.constant 0 : index
    %58 = vector.load %arg5[%c0_72, %c0_73, %c0_74, %c0_75] : memref<1x1x72x128xf32, #tpu.memory_space<vmem>>, vector<1x1x72x128xf32>
    %59 = vector.shape_cast %58 : vector<1x1x72x128xf32> to vector<72x128xf32>
    %60 = vector.shape_cast %57 : vector<72x128xf32> to vector<1x1x72x128xf32>
    tpu.vector_store %arg5[%c0_72, %c0_73, %c0_74, %c0_75], %60 {strides = array<i32>} : memref<1x1x72x128xf32, #tpu.memory_space<vmem>>, vector<1x1x72x128xf32>,
    return
  }
  func.func @transform_0(%arg0: i32, %arg1: i32) -> (i32, i32, i32, i32, i32) {
    %c0_i32 = arith.constant 0 : i32
    %c0_i32_0 = arith.constant 0 : i32
    %c0_i32_1 = arith.constant 0 : i32
    %c0_i32_2 = arith.constant 0 : i32
    return %arg0, %arg1, %c0_i32, %c0_i32_0, %c0_i32_1 : i32, i32, i32, i32, i32
  }
  func.func @transform_1(%arg0: i32, %arg1: i32) -> (i32, i32, i32) {
    %c0_i32 = arith.constant 0 : i32
    %c0_i32_0 = arith.constant 0 : i32
    %c0_i32_1 = arith.constant 0 : i32
    %c0_i32_2 = arith.constant 0 : i32
    return %c0_i32, %c0_i32_0, %c0_i32_1 : i32, i32, i32
  }
  func.func @transform_2(%arg0: i32, %arg1: i32) -> (i32, i32) {
    %c0_i32 = arith.constant 0 : i32
    %c0_i32_0 = arith.constant 0 : i32
    %c0_i32_1 = arith.constant 0 : i32
    return %c0_i32, %c0_i32_0 : i32, i32
  }
  func.func @transform_3(%arg0: i32, %arg1: i32) -> (i32, i32, i32, i32) {
    %c0_i32 = arith.constant 0 : i32
    %c0_i32_0 = arith.constant 0 : i32
    %c0_i32_1 = arith.constant 0 : i32
    return %arg0, %arg1, %c0_i32, %c0_i32_0 : i32, i32, i32, i32
  }
}

</mosaic_0001>

<bundles_post_ra>
// kernel: downsample_forward.1
= control target key start
LH: loop header
LB: loop body
LE: loop exit
PB: predicated region body
PF: predicated region fallthrough
CT: control target
= control target key end

     0   :  { %s1666_s12 = smov 0   ;;  %s1668_s13 = smov 0   ;;  %s1923_s0 = inlined_call_operand.vmem [shape: bf16[2,1,4,88,4], index: 0, kind: input, shape index: {}]   ;;  %s1924_s1 = inlined_call_operand.vmem [shape: bf16[9,4,128], index: 1, kind: input, shape index: {}]   ;;  %s1925_s2 = inlined_call_operand.vmem [shape: f32[1,128], index: 2, kind: input, shape index: {}]   ;;  %s1926_s3 = inlined_call_operand.vmem [shape: f32[2,1,72,128], index: 3, kind: output, shape index: {}]  }
   0x1   :  { %s1670_s14 = smov 0  }
   0x2 LB: > { %s25_s15 = sadd.s32 1, %s1640_s13  ;;  %p1309_p0 = scmp.ge.s32.totalorder %s1644_s14, 1  ;;  %s1644_s14 = sphi %s1670_s14, %s13_s14   ;;  %s1640_s13 = sphi %s1668_s13, %s1928_s13   ;;  %s1636_s12 = sphi %s1666_s12, %s1927_s12  }
   0x3   : > { %p27_p1 = scmp.ge.s32.totalorder %s25_s15, 2  ;;  %p157_p2 = scmp.lt.s32.totalorder %s1644_s14, 3 }
   0x5   : > { %s1930_s15 = smov (%p27_p1, %s25_s15), 0  ;;  %p158_p3 = pnand %p1309_p0, %p157_p2 }
   0x6   : > { %p189_p4 = scmp.lt.s32.totalorder (!%p158_p3), %s1636_s12, 1 }
   0x7   : > { %161 = sbr.rel (%p158_p3) target bundleno = 337 (0x151), region = 32 }
   0xc   : > { %v1321_v0 = vld [vmem:[%s1924_s1 + $0x2] sm:$0x3]  ;;  %vm269_vm0 = vcmask 1041408   ;;  %v1364_v2 = vld [vmem:[%s1924_s1 + $0x4] sm:$0x3]  ;;  %s1932_s12 = smov (!%p189_p4, %s1636_s12), 1 }
   0xd   : > { %v271_v1 = vsel %vm269_vm0, %v1321_v0, 0  ;;  %v217_v3 = vld [vmem:[%s1924_s1] sm:$0x3]  ;;  %v473_v4 = vsel %vm269_vm0, %v1364_v2, 0  ;;  %v1399_v6 = vld [vmem:[%s1924_s1 + $0x6] sm:$0x3] }
   0xe   : > { %1589 = vmatpush.bf16.msra.mxu1 %v271_v1  ;;  %1590 = vmatpush.bf16.msra.mxu2 %v271_v1  ;;  %v345_v5 = vsel %vm269_vm0, %v217_v3, 0  ;;  %v568_v7 = vsel %vm269_vm0, %v1399_v6, 0  ;;  %v1430_v8 = vld [vmem:[%s1924_s1 + $0x8] sm:$0x3]  ;;  %s1592_s26 = smul.u32 176, %s1932_s12  ;;  %vm253_vm1 = vcmask 31744  }
   0xf   : > { %1591 = vmatpush.bf16.msra.mxu3 %v271_v1  ;;  %280 = vmatpush.bf16.msra.mxu0 %v271_v1  ;;  %v663_v9 = vsel %vm269_vm0, %v1430_v8, 0  ;;  %v1488_v16 = vld [vmem:[%s1924_s1 + $0xc] sm:$0x3]  ;;  %v1520_v18 = vld [vmem:[%s1924_s1 + $0xe] sm:$0x3]  ;;  %vm1121_vm3 = vcmask 1046528  }
  0x10   : > { %s1710_s29 = scalar_lea.vmem %s1923_s0, %s1592_s26  ;;  %v935_v17 = vsel %vm269_vm0, %v1488_v16, 0  ;;  %v1462_v19 = vld [vmem:[%s1924_s1 + $0xa] sm:$0x3]  ;;  %v1071_v20 = vsel %vm269_vm0, %v1520_v18, 0  ;;  %v1546_v21 = vld [vmem:[%s1924_s1 + $0x10] sm:$0x3] }
  0x11   : > { %v1559_v10 = vld [vmem:[%s1710_s29 + $0x34] sm:$0xff]  ;;  %v1560_v11 = vld [vmem:[%s1710_s29 + $0x3c] sm:$0xff]  ;;  %v1320_v12 = vld [vmem:[%s1710_s29 + $0x4c] sm:$0xf]  ;;  %v799_v22 = vsel %vm269_vm0, %v1462_v19, 0  ;;  %v1147_v23 = vsel %vm269_vm0, %v1546_v21, 0 }
  0x12   : > { %482 = vmatpush.bf16.msrb.mxu2 %v473_v4  ;;  %354 = vmatpush.bf16.msrb.mxu1 %v345_v5  ;;  %v247_v13 = vunpack.c.l.b16 %v1320_v12  ;;  %v1558_v14 = vld [vmem:[%s1710_s29 + $0x2c] sm:$0xff]  ;;  %v1561_v24 = vld [vmem:[%s1710_s29 + $0x44] sm:$0xff]  ;;  %v1567_v28 = vld [vmem:[%s1710_s29 + $0x58] sm:$0xff]  ;;  %vm417_vm2 = vsmask.f32 7424  ;;  %s1593_s11 = smul.u32 72, %s1932_s12 }
  0x13   : > { %577 = vmatpush.bf16.msrb.mxu3 %v568_v7  ;;  %672 = vmatpush.bf16.msrb.mxu0 %v663_v9  ;;  %v1554_v25 = vld [vmem:[%s1710_s29] sm:$0xff]  ;;  %v1563_v29 = vld [vmem:[%s1710_s29 + $0x8] sm:$0xff]  ;;  %v1564_v40 = vld [vmem:[%s1710_s29 + $0x10] sm:$0xff] }
  0x14   : > { %1339 = vmatmul.msk.bf16.vlgmr.msra.gmra.mxu1 %vm253_vm1, %v1559_v10  ;;  %1340 = vmatmul.msk.bf16.vlgmr.msra.gmra.mxu2 %vm253_vm1, %v1560_v11  ;;  %v252_v15 = vpack.c.b16 %v247_v13, %v247_v13  ;;  %v1571_v26 = vld [vmem:[%s1710_s29 + $0x84] sm:$0xff]  ;;  %v426_v33 = vshll.u32 %v1563_v29, 16  ;;  %v1572_v38 = vld [vmem:[%s1710_s29 + $0x8c] sm:$0xff]  ;;  %v430_v41 = vshrl.u32 %v1563_v29, 16  ;;  %v434_v42 = vshll.u32 %v1564_v40, 16  ;;  %v1573_v47 = vld [vmem:[%s1710_s29 + $0x94] sm:$0xff]  ;;  %s1886_s20 = scalar_lea.vmem %s1926_s3, %s1593_s11 }
  0x15   : > { %1338 = vmatmul.msk.bf16.vlgmr.msra.gmra.mxu0 %vm253_vm1, %v1558_v14  ;;  %v1562_v27 = vld [vmem:[%s1710_s29] sm:$0xff]  ;;  %v1555_v36 = vld [vmem:[%s1710_s29 + $0x8] sm:$0xff]  ;;  %v1556_v45 = vld [vmem:[%s1710_s29 + $0x10] sm:$0xff]  ;;  %v438_v50 = vshrl.u32 %v1564_v40, 16 }
  0x16   : > { %1342 = vmatmul.msk.bf16.vlgmr.msra.gmra.mxu3 %vm253_vm1, %v252_v15  ;;  %944 = vmatpush.bf16.msra.mxu2 %v935_v17  ;;  %v421_v30 = vshll.u32 %v1562_v27, 16  ;;  %v419_v31 = vshrl.u32 %v1562_v27, 16  ;;  %v428_v35 = vrot.slane %v426_v33, 1  ;;  %v1568_v39 = vld [vmem:[%s1710_s29 + $0x60] sm:$0xff]  ;;  %v436_v44 = vrot.slane %v434_v42, 1  ;;  %v1569_v48 = vld [vmem:[%s1710_s29 + $0x68] sm:$0xff] }
  0x17   : > { %1080 = vmatpush.bf16.msra.mxu3 %v1071_v20  ;;  %808 = vmatpush.bf16.msra.mxu1 %v799_v22  ;;  %v1565_v49 = vld [vmem:[%s1710_s29 + $0x18] sm:$0xff]  ;;  %v1383_v57 = vld [vmem:[%s1710_s29 + $0x20] sm:$0xf]  ;;  %v1566_v58 = vld [vmem:[%s1710_s29 + $0x20] sm:$0x10] }
  0x18   : > { %1156 = vmatpush.bf16.msra.mxu0 %v1147_v23  ;;  %v423_v32 = vrot.slane %v421_v30, 1  ;;  %v432_v43 = vor.u32 %v430_v41, %v428_v35  ;;  %v442_v51 = vshll.u32 %v1565_v49, 16  ;;  %v440_v52 = vor.u32 %v438_v50, %v436_v44  ;;  %v1557_v54 = vld [vmem:[%s1710_s29 + $0x18] sm:$0xff]  ;;  %v1570_v59 = vld [vmem:[%s1710_s29 + $0x70] sm:$0xff]  ;;  %v216_v61 = vld [vmem:[%s1710_s29 + $0x20] sm:$0xf] }
  0x19   : > { %v1574_v56 = vld [vmem:[%s1710_s29 + $0x9c] sm:$0xff]  ;;  %v1384_v60 = vor.u32 %v1566_v58, %v1383_v57  ;;  %v446_v62 = vshrl.u32 %v1565_v49, 16  ;;  %v1429_v0 = vld [vmem:[%s1710_s29 + $0xa4] sm:$0xf]  ;;  %v323_v1 = vunpack.c.l.b16 %v216_v61  ;;  %v1398_v2 = vld [vmem:[%s1710_s29 + $0x78] sm:$0xf] }
  0x1a   : > { %v424_v34 = vor.u32 %v423_v32, %v419_v31  ;;  %v437_v46 = vsel %vm417_vm2, %v432_v43, %v436_v44  ;;  %v444_v53 = vrot.slane %v442_v51, 1  ;;  %v641_v5 = vunpack.c.l.b16 %v1429_v0  ;;  %v1575_v10 = vld [vmem:[%s1710_s29 + $0x58] sm:$0xff]  ;;  %v1632_v12 = vld [vmem:[%s1710_s29 + $0x4] sm:$0xe]  ;;  %v1584_v13 = vld [vmem:[%s1710_s29 + $0x30] sm:$0xff] }
  0x1b   : > { %v450_v63 = vshll.u32 %v1384_v60, 16  ;;  %v546_v6 = vunpack.c.l.b16 %v1398_v2  ;;  %v328_v7 = vpack.c.b16 %v323_v1, %v323_v1  ;;  %v1576_v14 = vld [vmem:[%s1710_s29 + $0x60] sm:$0xff]  ;;  %v747_v15 = vshll.u32 %v1575_v10, 16  ;;  %v1631_v17 = vld [vmem:[%s1710_s29 + $0x4] sm:$0xf0]  ;;  %v1585_v18 = vld [vmem:[%s1710_s29 + $0x38] sm:$0xff] }
  0x1c   : > { %v429_v37 = vsel %vm417_vm2, %v424_v34, %v428_v35  ;;  %v445_v55 = vsel %vm417_vm2, %v440_v52, %v444_v53  ;;  %v448_v3 = vor.u32 %v446_v62, %v444_v53  ;;  %v646_v9 = vpack.c.b16 %v641_v5, %v641_v5  ;;  %v844_v16 = vld [vmem:[%s1710_s29 + $0x4] sm:$0xff]   ;;  %v1580_v23 = vld [vmem:[%s1710_s29 + $0xc] sm:$0xff] }
  0x1d   : > { %v452_v4 = vrot.slane %v450_v63, 1  ;;  %v551_v11 = vpack.c.b16 %v546_v6, %v546_v6  ;;  %v1019_v19 = vshll.u32 %v1584_v13, 16  ;;  %v745_v20 = vshrl.u32 %v1575_v10, 16  ;;  %v1586_v42 = vld [vmem:[%s1710_s29 + $0x40] sm:$0xff]  ;;  %v1578_v61 = vld [vmem:[%s1710_s29 + $0x70] sm:$0xff]  ;;  %v1587_v62 = vld [vmem:[%s1710_s29 + $0x48] sm:$0xff] }
  0x1e   : > { %v749_v21 = vrot.slane %v747_v15, 1  ;;  %v752_v22 = vshll.u32 %v1576_v14, 16  ;;  %v1123_v32 = vrot.slane %v1580_v23, 1  ;;  %v883_v40 = vshll.u32 %v844_v16, 16 }
  0x1f   : > { %v453_v8 = vsel %vm417_vm2, %v448_v3, %v452_v4  ;;  %v1021_v27 = vrot.slane %v1019_v19, 1  ;;  %v756_v41 = vshrl.u32 %v1576_v14, 16  ;;  %v881_v44 = vshrl.u32 %v844_v16, 16  ;;  %v1815_v3 = vld [vmem:[%s1710_s29 + $0x1c] sm:$0xff] }
  0x20   : > { %v750_v29 = vor.u32 %v749_v21, %v745_v20  ;;  %v754_v30 = vrot.slane %v752_v22, 1  ;;  %v1032_v49 = vshll.u32 %v1586_v42, 16  ;;  %v768_v0 = vshll.u32 %v1578_v61, 16  ;;  %v1579_v19 = vld [vmem:[%s1710_s29 + $0x78] sm:$0x10] }
  0x21   : > { %v892_v1 = vshrl.u32 %v1580_v23, 16  ;;  %v1040_v5 = vshll.u32 %v1587_v62, 16  ;;  %v1127_v10 = vrot.slane %v1815_v3, 1  ;;  %v1539_v22 = vld [vmem:[%s1710_s29 + $0x50] sm:$0xf] }
  0x22   : > { %v758_v50 = vor.u32 %v756_v41, %v754_v30 }
  0x24   : > { %1341 = vmatmul.msk.bf16.gmra.mxu2 %vm253_vm1, %v1561_v24  ;;  %1359 = vmatmul.msk.bf16.vlgmr.msrb.gmra.mxu1 %vm253_vm1, %v1554_v25  ;;  %v1633_v24 = vor.u32 %v1632_v12, %v1631_v17  ;;  %v454_v25 = vshrl.u32 %v1384_v60, 16  ;;  %v1042_v12 = vrot.slane %v1040_v5, 1 }
  0x25   : > { %1447 = vmatmul.msk.bf16.vlgmr.msrb.gmra.mxu0 %vm253_vm1, %v1571_v26  ;;  %v1017_v26 = vshrl.u32 %v1584_v13, 16 }
  0x26   : > { %1416 = vmatmul.msk.bf16.vlgmr.msrb.gmra.mxu3 %vm253_vm1, %v1567_v28  ;;  %v1024_v28 = vshll.u32 %v1585_v18, 16  ;;  %v1122_v31 = vrot.slane %v1633_v24, 1  ;;  %v456_v33 = vor.u32 %v454_v25, %v452_v4  ;;  %v1036_v4 = vshrl.u32 %v1586_v42, 16  ;;  %v1503_v25 = vld [vmem:[%s1710_s29 + $0x24] sm:$0xf] }
  0x27   : > { %v1022_v34 = vor.u32 %v1021_v27, %v1017_v26  ;;  %v1583_v26 = vld [vmem:[%s1710_s29 + $0x24] sm:$0x10] }
  0x28   : > { %v1026_v35 = vrot.slane %v1024_v28, 1 }
  0x34   : > { %1360 = vmatmul.msk.bf16.gmra.mxu1 %vm253_vm1, %v1555_v36  ;;  %1385 = vmatmul.msk.bf16.vlgmr.msrb.gmra.mxu2 %vm253_vm1, %v429_v37  ;;  %v755_v36 = vsel %vm417_vm2, %v750_v29, %v754_v30  ;;  %v1124_v37 = vsel %vm1121_vm3, %v1122_v31, %v1123_v32  ;;  %v772_v29 = vshrl.u32 %v1578_v61, 16 }
  0x35   : > { %1448 = vmatmul.msk.bf16.gmra.mxu0 %vm253_vm1, %v1572_v38  ;;  %v1027_v38 = vsel %vm417_vm2, %v1022_v34, %v1026_v35 }
  0x36   : > { %1417 = vmatmul.msk.bf16.gmra.mxu3 %vm253_vm1, %v1568_v39  ;;  %v1577_v39 = vld [vmem:[%s1710_s29 + $0x68] sm:$0xff] }
  0x37   : > { %v760_v43 = vshll.u32 %v1577_v39, 16  ;;  %v764_v63 = vshrl.u32 %v1577_v39, 16 }
  0x39   : > { %v762_v51 = vrot.slane %v760_v43, 1 }
  0x3b   : > { %v763_v57 = vsel %vm417_vm2, %v758_v50, %v762_v51  ;;  %v766_v6 = vor.u32 %v764_v63, %v762_v51 }
  0x44   : > { %1361 = vmatmul.msk.bf16.gmra.mxu1 %vm253_vm1, %v1556_v45  ;;  %1386 = vmatmul.msk.bf16.gmra.mxu2 %vm253_vm1, %v437_v46  ;;  %v885_v45 = vrot.slane %v883_v40, 1  ;;  %v888_v46 = vshll.u32 %v1580_v23, 16  ;;  %v1588_v23 = vld [vmem:[%s1710_s29 + $0x50] sm:$0x10] }
  0x45   : > { %1449 = vmatmul.msk.bf16.gmra.mxu0 %vm253_vm1, %v1573_v47  ;;  %v1800_v47 = vld [vmem:[%s1710_s29 + $0x14] sm:$0xff]  ;;  %v1540_v27 = vor.u32 %v1588_v23, %v1539_v22 }
  0x46   : > { %1418 = vmatmul.msk.bf16.gmra.mxu3 %vm253_vm1, %v1569_v48  ;;  %v1028_v48 = vshrl.u32 %v1585_v18, 16  ;;  %v886_v52 = vor.u32 %v885_v45, %v881_v44  ;;  %v890_v53 = vrot.slane %v888_v46, 1  ;;  %v896_v2 = vshll.u32 %v1800_v47, 16  ;;  %v1481_v18 = vld [vmem:[%s1710_s29 + $0x78] sm:$0xf] }
  0x47   : > { %v1482_v21 = vor.u32 %v1579_v19, %v1481_v18  ;;  %v900_v31 = vshrl.u32 %v1800_v47, 16 }
  0x48   : > { %v891_v58 = vsel %vm417_vm2, %v886_v52, %v890_v53 }
  0x49   : > { %v776_v30 = vshll.u32 %v1482_v21, 16  ;;  %v780_v61 = vshrl.u32 %v1482_v21, 16 }
  0x4b   : > { %v778_v39 = vrot.slane %v776_v30, 1 }
  0x54   : > { %1362 = vmatmul.msk.bf16.gmra.mxu1 %vm253_vm1, %v1557_v54  ;;  %1387 = vmatmul.msk.bf16.gmra.mxu2 %vm253_vm1, %v445_v55  ;;  %v1125_v54 = vrot.slane %v1800_v47, 1  ;;  %v1030_v55 = vor.u32 %v1028_v48, %v1026_v35  ;;  %v1504_v35 = vor.u32 %v1583_v26, %v1503_v25 }
  0x55   : > { %1450 = vmatmul.msk.bf16.gmra.mxu0 %vm253_vm1, %v1574_v56  ;;  %v1034_v56 = vrot.slane %v1032_v49, 1 }
  0x56   : > { %1419 = vmatmul.msk.bf16.gmra.mxu3 %vm253_vm1, %v1570_v59  ;;  %v1126_v59 = vsel %vm1121_vm3, %v1123_v32, %v1125_v54  ;;  %v1128_v17 = vsel %vm1121_vm3, %v1125_v54, %v1127_v10  ;;  %v904_v32 = vshll.u32 %v1815_v3, 16  ;;  %v1129_v42 = vrot.slane %v1504_v35, 1 }
  0x57   : > { %v1035_v60 = vsel %vm417_vm2, %v1030_v55, %v1034_v56 }
  0x58   : > { %v906_v41 = vrot.slane %v904_v32, 1  ;;  %v1130_v52 = vsel %vm1121_vm3, %v1127_v10, %v1129_v42 }
  0x64   : > { %1363 = vmatmul.msk.bf16.gmra.mxu1 %vm253_vm1, %v328_v7  ;;  %1388 = vmatmul.msk.bf16.gmra.mxu2 %vm253_vm1, %v453_v8  ;;  %v770_v7 = vrot.slane %v768_v0, 1  ;;  %v894_v8 = vor.u32 %v892_v1, %v890_v53  ;;  %v1052_v1 = vshrl.u32 %v1540_v27, 16 }
  0x65   : > { %1451 = vmatmul.msk.bf16.gmra.mxu0 %vm253_vm1, %v646_v9  ;;  %v898_v9 = vrot.slane %v896_v2, 1  ;;  %v782_v2 = vor.u32 %v780_v61, %v778_v39 }
  0x66   : > { %1420 = vmatmul.msk.bf16.gmra.mxu3 %vm253_vm1, %v551_v11  ;;  %v1038_v11 = vor.u32 %v1036_v4, %v1034_v56  ;;  %v771_v14 = vsel %vm417_vm2, %v766_v6, %v770_v7  ;;  %v908_v56 = vshrl.u32 %v1815_v3, 16 }
  0x67   : > { %v899_v15 = vsel %vm417_vm2, %v894_v8, %v898_v9  ;;  %v902_v40 = vor.u32 %v900_v31, %v898_v9 }
  0x68   : > { %v1043_v20 = vsel %vm417_vm2, %v1038_v11, %v1042_v12 }
  0x69   : > { %v907_v47 = vsel %vm417_vm2, %v902_v40, %v906_v41 }
  0x74   : > { %1389 = vmatmul.msk.bf16.gmra.mxu2 %vm253_vm1, %v456_v33  ;;  %1483 = vmatmul.msk.bf16.vlgmr.msra.gmra.mxu1 %vm253_vm1, %v755_v36  ;;  %v1044_v36 = vshrl.u32 %v1587_v62, 16  ;;  %v910_v62 = vor.u32 %v908_v56, %v906_v41 }
  0x75   : > { %1547 = vmatmul.msk.bf16.vlgmr.msra.gmra.mxu0 %vm253_vm1, %v1124_v37  ;;  %v1048_v37 = vshll.u32 %v1540_v27, 16 }
  0x76   : > { %1541 = vmatmul.msk.bf16.vlgmr.msra.gmra.mxu3 %vm253_vm1, %v1027_v38  ;;  %v774_v38 = vor.u32 %v772_v29, %v770_v7  ;;  %v1046_v44 = vor.u32 %v1044_v36, %v1042_v12 }
  0x77   : > { %v1050_v45 = vrot.slane %v1048_v37, 1 }
  0x78   : > { %v779_v48 = vsel %vm417_vm2, %v774_v38, %v778_v39 }
  0x79   : > { %v1051_v53 = vsel %vm417_vm2, %v1046_v44, %v1050_v45  ;;  %v1054_v9 = vor.u32 %v1052_v1, %v1050_v45 }
  0x84   : > { %1484 = vmatmul.msk.bf16.gmra.mxu1 %vm253_vm1, %v763_v57  ;;  %1505 = vmatmul.msk.bf16.vlgmr.msra.gmra.mxu2 %vm253_vm1, %v891_v58  ;;  %v912_v57 = vshll.u32 %v1504_v35, 16 }
  0x85   : > { %1548 = vmatmul.msk.bf16.gmra.mxu0 %vm253_vm1, %v1126_v59 }
  0x86   : > { %1542 = vmatmul.msk.bf16.gmra.mxu3 %vm253_vm1, %v1035_v60  ;;  %v914_v63 = vrot.slane %v912_v57, 1 }
  0x88   : > { %v915_v5 = vsel %vm417_vm2, %v910_v62, %v914_v63 }
  0x91   : > { %v1818_v13 = vpop.f32.mrf.mxu1 }
  0x92   : > { %v282_v16 = vpop.f32.mrf.mxu0 }
  0x94   : > { %1485 = vmatmul.msk.bf16.gmra.mxu1 %vm253_vm1, %v771_v14  ;;  %1506 = vmatmul.msk.bf16.gmra.mxu2 %vm253_vm1, %v899_v15 }
  0x95   : > { %1549 = vmatmul.msk.bf16.gmra.mxu0 %vm253_vm1, %v1128_v17  ;;  %v916_v17 = vshrl.u32 %v1504_v35, 16 }
  0x96   : > { %1543 = vmatmul.msk.bf16.gmra.mxu3 %vm253_vm1, %v1043_v20 }
  0x97   : > { %v1831_v24 = vpop.f32.mrf.mxu2  ;;  %v918_v20 = vor.u32 %v916_v17, %v914_v63 }
  0x99   : > { %v289_v28 = vpop.f32.mrf.mxu1  ;;  %v1838_v33 = vpop.f32.mrf.mxu3 }
  0x9a   : > { %v284_v34 = vpop.f32.mrf.mxu0 }
  0x9f   : > { %v294_v43 = vpop.f32.mrf.mxu2 }
  0xa1   : > { %v356_v46 = vpop.f32.mrf.mxu1  ;;  %v304_v50 = vpop.f32.mrf.mxu3 }
  0xa2   : > { %v357_v49 = vadd.f32 %v356_v46, %v282_v16  ;;  %v674_v51 = vpop.f32.mrf.mxu0 }
  0xa4   : > { %1486 = vmatmul.msk.bf16.gmra.mxu1 %vm253_vm1, %v779_v48  ;;  %1507 = vmatmul.msk.bf16.gmra.mxu2 %vm253_vm1, %v907_v47 }
  0xa5   : > { %1550 = vmatmul.msk.bf16.gmra.mxu0 %vm253_vm1, %v1130_v52 }
  0xa6   : > { %1544 = vmatmul.msk.bf16.gmra.mxu3 %vm253_vm1, %v1051_v53 }
  0xa7   : > { %v297_v54 = vpop.f32.mrf.mxu2 }
  0xa9   : > { %v358_v55 = vpop.f32.mrf.mxu1  ;;  %v579_v59 = vpop.f32.mrf.mxu3 }
  0xaa   : > { %v359_v58 = vadd.f32 %v358_v55, %v284_v34  ;;  %v676_v60 = vpop.f32.mrf.mxu0 }
  0xaf   : > { %v299_v0 = vpop.f32.mrf.mxu2 }
  0xb1   : > { %v361_v4 = vpop.f32.mrf.mxu1  ;;  %v581_v7 = vpop.f32.mrf.mxu3 }
  0xb2   : > { %v362_v6 = vadd.f32 %v361_v4, %v1818_v13  ;;  %v679_v8 = vpop.f32.mrf.mxu0 }
  0xb4   : > { %1487 = vmatmul.msk.bf16.gmra.mxu1 %vm253_vm1, %v782_v2  ;;  %1508 = vmatmul.msk.bf16.gmra.mxu2 %vm253_vm1, %v915_v5 }
  0xb5   : > { %1551 = vmatmul.msk.bf16.gmra.mxu0 %vm253_vm1, %v1129_v42 }
  0xb6   : > { %1545 = vmatmul.msk.bf16.gmra.mxu3 %vm253_vm1, %v1054_v9 }
  0xb7   : > { %v484_v3 = vpop.f32.mrf.mxu2 }
  0xb8   : > { %v508_v10 = vadd.f32 %v484_v3, %v357_v49 }
  0xb9   : > { %v363_v11 = vpop.f32.mrf.mxu1  ;;  %v584_v15 = vpop.f32.mrf.mxu3 }
  0xba   : > { %v603_v12 = vadd.f32 %v579_v59, %v508_v10  ;;  %v364_v14 = vadd.f32 %v363_v11, %v289_v28  ;;  %v681_v16 = vpop.f32.mrf.mxu0 }
  0xbc   : > { %v1855_v13 = vadd.f32 %v674_v51, %v603_v12 }
  0xbf   : > { %v486_v18 = vpop.f32.mrf.mxu2 }
  0xc0   : > { %v509_v19 = vadd.f32 %v486_v18, %v359_v58 }
  0xc1   : > { %v366_v21 = vpop.f32.mrf.mxu1  ;;  %v586_v25 = vpop.f32.mrf.mxu3 }
  0xc2   : > { %v604_v22 = vadd.f32 %v581_v7, %v509_v19  ;;  %v367_v23 = vadd.f32 %v366_v21, %v1831_v24  ;;  %v684_v26 = vpop.f32.mrf.mxu0 }
  0xc4   : > { %1509 = vmatmul.msk.bf16.gmra.mxu2 %vm253_vm1, %v918_v20  ;;  %v1859_v27 = vadd.f32 %v676_v60, %v604_v22 }
  0xc7   : > { %v489_v29 = vpop.f32.mrf.mxu2 }
  0xc8   : > { %v510_v28 = vadd.f32 %v489_v29, %v362_v6  ;;  %v1881_v29 = vld [vmem:[%s1925_s2] ss:$0 sm:$0xff] }
  0xc9   : > { %v368_v30 = vpop.f32.mrf.mxu1  ;;  %v589_v34 = vpop.f32.mrf.mxu3 }
  0xca   : > { %v605_v31 = vadd.f32 %v584_v15, %v510_v28  ;;  %v369_v32 = vadd.f32 %v368_v30, %v294_v43  ;;  %v686_v35 = vpop.f32.mrf.mxu0 }
  0xcc   : > { %v1861_v36 = vadd.f32 %v679_v8, %v605_v31 }
  0xcf   : > { %v491_v37 = vpop.f32.mrf.mxu2 }
  0xd0   : > { %v511_v38 = vadd.f32 %v491_v37, %v364_v14 }
  0xd1   : > { %v371_v39 = vpop.f32.mrf.mxu1  ;;  %v591_v41 = vpop.f32.mrf.mxu3 }
  0xd2   : > { %v606_v40 = vadd.f32 %v586_v25, %v511_v38  ;;  %v372_v24 = vadd.f32 %v371_v39, %v297_v54  ;;  %v689_v42 = vpop.f32.mrf.mxu0 }
  0xd4   : > { %v1863_v44 = vadd.f32 %v681_v16, %v606_v40 }
  0xd7   : > { %v494_v45 = vpop.f32.mrf.mxu2 }
  0xd8   : > { %v512_v46 = vadd.f32 %v494_v45, %v367_v23 }
  0xd9   : > { %v373_v48 = vpop.f32.mrf.mxu1  ;;  %v594_v50 = vpop.f32.mrf.mxu3 }
  0xda   : > { %v607_v47 = vadd.f32 %v589_v34, %v512_v46  ;;  %v374_v49 = vadd.f32 %v373_v48, %v299_v0  ;;  %v691_v43 = vpop.f32.mrf.mxu0 }
  0xdc   : > { %v1865_v51 = vadd.f32 %v684_v26, %v607_v47 }
  0xdf   : > { %v496_v52 = vpop.f32.mrf.mxu2 }
  0xe0   : > { %v513_v53 = vadd.f32 %v496_v52, %v369_v32 }
  0xe1   : > { %v376_v55 = vpop.f32.mrf.mxu1  ;;  %v596_v54 = vpop.f32.mrf.mxu3 }
  0xe2   : > { %v608_v56 = vadd.f32 %v591_v41, %v513_v53  ;;  %v377_v57 = vadd.f32 %v376_v55, %v1838_v33  ;;  %v694_v58 = vpop.f32.mrf.mxu0 }
  0xe4   : > { %v1868_v59 = vadd.f32 %v686_v35, %v608_v56 }
  0xe7   : > { %v499_v60 = vpop.f32.mrf.mxu2 }
  0xe8   : > { %v514_v61 = vadd.f32 %v499_v60, %v372_v24 }
  0xe9   : > { %v378_v62 = vpop.f32.mrf.mxu1  ;;  %v599_v1 = vpop.f32.mrf.mxu3 }
  0xea   : > { %v609_v63 = vadd.f32 %v594_v50, %v514_v61  ;;  %v696_v0 = vpop.f32.mrf.mxu0 }
  0xec   : > { %v1870_v2 = vadd.f32 %v689_v42, %v609_v63 }
  0xef   : > { %v501_v4 = vpop.f32.mrf.mxu2 }
  0xf0   : > { %v515_v5 = vadd.f32 %v501_v4, %v374_v49 }
  0xf1   : > { %v810_v6 = vpop.f32.mrf.mxu1  ;;  %v601_v8 = vpop.f32.mrf.mxu3 }
  0xf2   : > { %v610_v7 = vadd.f32 %v596_v54, %v515_v5  ;;  %v1158_v9 = vpop.f32.mrf.mxu0  ;;  %v834_v21 = vadd.f32 %v810_v6, %v1855_v13 }
  0xf4   : > { %v1872_v33 = vadd.f32 %v691_v43, %v610_v7 }
  0xf7   : > { %v504_v3 = vpop.f32.mrf.mxu2 }
  0xf8   : > { %v516_v10 = vadd.f32 %v504_v3, %v377_v57 }
  0xf9   : > { %v812_v11 = vpop.f32.mrf.mxu1  ;;  %v1082_v14 = vpop.f32.mrf.mxu3 }
  0xfa   : > { %v611_v12 = vadd.f32 %v599_v1, %v516_v10  ;;  %v1160_v15 = vpop.f32.mrf.mxu0  ;;  %v835_v13 = vadd.f32 %v812_v11, %v1859_v27 }
  0xfc   : > { %v1874_v16 = vadd.f32 %v694_v58, %v611_v12 }
  0xff   : > { %v506_v17 = vpop.f32.mrf.mxu2 }
 0x101   : > { %v815_v18 = vpop.f32.mrf.mxu1  ;;  %v1084_v19 = vpop.f32.mrf.mxu3 }
 0x102   : > { %v1163_v20 = vpop.f32.mrf.mxu0  ;;  %v836_v41 = vadd.f32 %v815_v18, %v1861_v36 }
 0x107   : > { %v946_v22 = vpop.f32.mrf.mxu2 }
 0x108   : > { %v970_v23 = vadd.f32 %v946_v22, %v834_v21 }
 0x109   : > { %v817_v25 = vpop.f32.mrf.mxu1  ;;  %v1087_v28 = vpop.f32.mrf.mxu3 }
 0x10a   : > { %v1106_v26 = vadd.f32 %v1082_v14, %v970_v23  ;;  %v1165_v30 = vpop.f32.mrf.mxu0  ;;  %v837_v43 = vadd.f32 %v817_v25, %v1863_v44 }
 0x10c   : > { %v1182_v31 = vadd.f32 %v1158_v9, %v1106_v26 }
 0x10e   : > { %v1195_v32 = vadd.f32 %v1881_v29, %v1182_v31 }
 0x10f   : > { %v948_v34 = vpop.f32.mrf.mxu2 }
 0x110   : > { %1204 = vst [vmem:[%s1886_s20] sm:$0xff] %v1195_v32  ;;  %v971_v35 = vadd.f32 %v948_v34, %v835_v13 }
 0x111   : > { %v820_v37 = vpop.f32.mrf.mxu1  ;;  %v1089_v39 = vpop.f32.mrf.mxu3 }
 0x112   : > { %v1107_v38 = vadd.f32 %v1084_v19, %v971_v35  ;;  %v1168_v40 = vpop.f32.mrf.mxu0  ;;  %v838_v60 = vadd.f32 %v820_v37, %v1865_v51 }
 0x114   : > { %v1183_v24 = vadd.f32 %v1160_v15, %v1107_v38 }
 0x116   : > { %v1196_v42 = vadd.f32 %v1881_v29, %v1183_v24 }
 0x117   : > { %v951_v45 = vpop.f32.mrf.mxu2 }
 0x118   : > { %1205 = vst [vmem:[%s1886_s20 + $0x8] sm:$0xff] %v1196_v42  ;;  %v972_v46 = vadd.f32 %v951_v45, %v836_v41 }
 0x119   : > { %v822_v48 = vpop.f32.mrf.mxu1  ;;  %v1092_v47 = vpop.f32.mrf.mxu3 }
 0x11a   : > { %v1108_v27 = vadd.f32 %v1087_v28, %v972_v46  ;;  %v1170_v49 = vpop.f32.mrf.mxu0  ;;  %v839_v6 = vadd.f32 %v822_v48, %v1868_v59 }
 0x11c   : > { %v1184_v50 = vadd.f32 %v1163_v20, %v1108_v27 }
 0x11e   : > { %v1197_v52 = vadd.f32 %v1881_v29, %v1184_v50 }
 0x11f   : > { %v953_v53 = vpop.f32.mrf.mxu2 }
 0x120   : > { %1206 = vst [vmem:[%s1886_s20 + $0x10] sm:$0xff] %v1197_v52  ;;  %v973_v55 = vadd.f32 %v953_v53, %v837_v43 }
 0x121   : > { %v825_v56 = vpop.f32.mrf.mxu1  ;;  %v1094_v57 = vpop.f32.mrf.mxu3 }
 0x122   : > { %v1109_v36 = vadd.f32 %v1089_v39, %v973_v55  ;;  %v1173_v54 = vpop.f32.mrf.mxu0  ;;  %v840_v14 = vadd.f32 %v825_v56, %v1870_v2 }
 0x124   : > { %v1185_v58 = vadd.f32 %v1165_v30, %v1109_v36 }
 0x126   : > { %v1198_v61 = vadd.f32 %v1881_v29, %v1185_v58 }
 0x127   : > { %v956_v62 = vpop.f32.mrf.mxu2 }
 0x128   : > { %1207 = vst [vmem:[%s1886_s20 + $0x18] sm:$0xff] %v1198_v61  ;;  %v974_v63 = vadd.f32 %v956_v62, %v838_v60 }
 0x129   : > { %v827_v1 = vpop.f32.mrf.mxu1  ;;  %v1097_v0 = vpop.f32.mrf.mxu3 }
 0x12a   : > { %v1110_v44 = vadd.f32 %v1092_v47, %v974_v63  ;;  %v1175_v4 = vpop.f32.mrf.mxu0  ;;  %v841_v23 = vadd.f32 %v827_v1, %v1872_v33 }
 0x12c   : > { %v1186_v5 = vadd.f32 %v1168_v40, %v1110_v44 }
 0x12e   : > { %v1199_v7 = vadd.f32 %v1881_v29, %v1186_v5 }
 0x12f   : > { %v958_v8 = vpop.f32.mrf.mxu2 }
 0x130   : > { %1208 = vst [vmem:[%s1886_s20 + $0x20] sm:$0xff] %v1199_v7  ;;  %v975_v9 = vadd.f32 %v958_v8, %v839_v6 }
 0x131   : > { %v830_v3 = vpop.f32.mrf.mxu1  ;;  %v1099_v10 = vpop.f32.mrf.mxu3 }
 0x132   : > { %v1111_v51 = vadd.f32 %v1094_v57, %v975_v9  ;;  %v1178_v11 = vpop.f32.mrf.mxu0  ;;  %v842_v13 = vadd.f32 %v830_v3, %v1874_v16 }
 0x134   : > { %v1187_v12 = vadd.f32 %v1170_v49, %v1111_v51 }
 0x136   : > { %v1200_v15 = vadd.f32 %v1881_v29, %v1187_v12 }
 0x137   : > { %v961_v17 = vpop.f32.mrf.mxu2 }
 0x138   : > { %1209 = vst [vmem:[%s1886_s20 + $0x28] sm:$0xff] %v1200_v15  ;;  %v976_v18 = vadd.f32 %v961_v17, %v840_v14 }
 0x139   : > { %v832_v19 = vpop.f32.mrf.mxu1  ;;  %v1102_v20 = vpop.f32.mrf.mxu3 }
 0x13a   : > { %v1112_v59 = vadd.f32 %v1097_v0, %v976_v18  ;;  %v1180_v21 = vpop.f32.mrf.mxu0 }
 0x13c   : > { %v1188_v22 = vadd.f32 %v1173_v54, %v1112_v59 }
 0x13e   : > { %v1201_v25 = vadd.f32 %v1881_v29, %v1188_v22 }
 0x13f   : > { %v963_v26 = vpop.f32.mrf.mxu2 }
 0x140   : > { %1210 = vst [vmem:[%s1886_s20 + $0x30] sm:$0xff] %v1201_v25  ;;  %v977_v28 = vadd.f32 %v963_v26, %v841_v23 }
 0x141   : > { %v1104_v30 = vpop.f32.mrf.mxu3 }
 0x142   : > { %v1113_v2 = vadd.f32 %v1099_v10, %v977_v28 }
 0x144   : > { %v1189_v31 = vadd.f32 %v1175_v4, %v1113_v2 }
 0x146   : > { %v1202_v32 = vadd.f32 %v1881_v29, %v1189_v31 }
 0x147   : > { %v966_v34 = vpop.f32.mrf.mxu2 }
 0x148   : > { %1211 = vst [vmem:[%s1886_s20 + $0x38] sm:$0xff] %v1202_v32  ;;  %v978_v35 = vadd.f32 %v966_v34, %v842_v13 }
 0x14a   : > { %v1114_v37 = vadd.f32 %v1102_v20, %v978_v35 }
 0x14c   : > { %v1190_v38 = vadd.f32 %v1178_v11, %v1114_v37 }
 0x14e   : > { %v1203_v33 = vadd.f32 %v1881_v29, %v1190_v38 }
 0x14f   : > { %v968_v39 = vpop.f32.mrf.mxu2 }
 0x150   : > { %1212 = vst [vmem:[%s1886_s20 + $0x40] sm:$0xff] %v1203_v33 }
 0x151 PF: > { %s13_s14 = sadd.s32 1, %s1644_s14   ;;  %s1927_s12 = smov %s1640_s13 }
 0x152   : > { %p10_p5 = scmp.ge.s32.totalorder %s13_s14, 4   ;;  %s1928_s13 = smov %s1930_s15 }
 0x154   :  { %12 = sbr.rel (!%p10_p5) target bundleno = 2 (0x2), region = 73 }

</bundles_post_ra>
